<compile_context>
chip_gen: v7x
topology: tpu7x:2x2x1
jax: 0.10.0
libtpu: 0.0.40
codegen_flags: <defaults>
</compile_context>

<pallas_src>
from functools import partial

import jax
import jax.numpy as jnp
from jax.experimental import pallas as pl
from jax.experimental.pallas import tpu as pltpu

EPS = 1e-6
NOISE_VAR = 1e-5
STEP_SIZE = 1e-3   # unused at runtime: noise gradient is always None (see NOTE)
NUM_STEPS = 1


# ----------------------------- Pallas kernels -----------------------------

def _smart_fused_kernel(embed_ref, noise_ref, poolt_ref, w1_ref, b1_ref,
                        w2_ref, b2_ref, state_ref, loss_ref, pooled_acc,
                        *, num_steps):
    """Fused SMART forward over one tile of flattened (B*S) rows.

    Grid axis 0 is a reduction over row tiles: the masked mean-pool is
    accumulated into `pooled_acc` (VMEM scratch); the head + MSE loss run
    only on the last grid step.
    """
    i = pl.program_id(0)

    @pl.when(i == 0)
    def _init():
        pooled_acc[...] = jnp.zeros_like(pooled_acc)

    # --- SMART noise refinement ---------------------------------------
    # NOTE: in the reference, eval_fn consumes embed_perturbed.long(), which
    # severs the autograd path to `noise`; torch.autograd.grad returns None,
    # so `step = noise` exactly and the intermediate eval/loss calls are
    # numerically dead -> they are skipped here (only the normalizations and
    # the final eval are computed).
    # TODO(synk): if a differentiable eval_fn were supplied, the
    # `step = noise + step_size * grad` branch would need jax.grad here.
    noise = noise_ref[...]                                  # (TR, H)
    for _ in range(num_steps):                              # static unroll
        n = jnp.max(jnp.abs(noise), axis=-1, keepdims=True)  # inf-norm over H
        noise = noise * pl.reciprocal(n + EPS, approx=True)   # EUP, not VALU

    # embed_perturbed.long(): truncation toward zero (torch semantics).
    ids = jnp.trunc(embed_ref[...] + noise)                 # (TR, H)

    # Synthetic eval_fn trunk: relu(ids @ w1 + b1) as one clean 2-D MXU
    # contraction over the flattened rows.  ids are small integers -> exact
    # in bf16; bias/relu stay in f32 (v5e has no bf16 VPU path).
    h = jnp.dot(ids.astype(jnp.bfloat16),
                w1_ref[...].astype(jnp.bfloat16),
                preferred_element_type=jnp.float32) + b1_ref[...]
    h = jnp.maximum(h, 0.0)                                 # (TR, D)

    # Masked mean-pool expressed as a matmul (row reduction on the MXU, not
    # the XLU).  pool_t[r, b] already carries mask[b, s] / denom[b].
    pooled_acc[...] += jnp.dot(poolt_ref[...].T, h,
                               preferred_element_type=jnp.float32)  # (B, D)

    @pl.when(i == pl.num_programs(0) - 1)
    def _finalize():
        logits = jnp.dot(pooled_acc[...], w2_ref[...],
                         preferred_element_type=jnp.float32) + b2_ref[...]
        d = logits - state_ref[...]
        # (1,1) writeback is 4 bytes; lane density is irrelevant at this size.
        loss_ref[...] = jnp.mean(d * d).reshape(1, 1)       # MSE loss_last_fn


def _eval_logits_kernel(embed_ref, poolt_ref, w1_ref, b1_ref, w2_ref, b2_ref,
                        logits_ref):
    """Clean eval_fn(embed.long(), mask) -> logits (used to build `state`)."""
    ids = jnp.trunc(embed_ref[...])
    h = jnp.dot(ids.astype(jnp.bfloat16),
                w1_ref[...].astype(jnp.bfloat16),
                preferred_element_type=jnp.float32) + b1_ref[...]
    h = jnp.maximum(h, 0.0)
    pooled = jnp.dot(poolt_ref[...].T, h, preferred_element_type=jnp.float32)
    logits_ref[...] = jnp.dot(pooled, w2_ref[...],
                              preferred_element_type=jnp.float32) + b2_ref[...]


# ------------------------------ wrappers -----------------------------------

def _build_pool_t(input_mask):
    """Transposed masked-mean-pool matrix, shape (B*S, B).

    pool_t[b*S + s, b'] = mask[b, s] / max(sum_s mask[b, s], 1)  if b == b'
    Layout plumbing done on the XLA side (cheap, fused under jit) so the
    kernel's S-axis reduction is a plain MXU contraction.
    """
    B, S = input_mask.shape
    m = input_mask.astype(jnp.float32)
    denom = jnp.maximum(jnp.sum(m, axis=1, keepdims=True), 1.0)   # (B, 1)
    scale = m / denom                                             # (B, S)
    eye = jnp.eye(B, dtype=jnp.float32)                           # (B, B)
    return (scale[:, :, None] * eye[:, None, :]).reshape(B * S, B)


@partial(jax.jit, static_argnames=('task', 'num_steps', 'row_tile'))
def smart_loss_3label(embed, state, input_mask, params, *, key, task='sent',
                      num_steps=NUM_STEPS, row_tile=256):
    """Forward pass of SMARTLoss3Label (single fused pallas_call, jitted)."""
    B, S, H = embed.shape
    R = B * S

    # noise = torch.randn_like(embed.float()) * noise_var
    noise = jax.random.normal(key, (B, S, H), jnp.float32) * NOISE_VAR

    # The three task branches ('sent' / 'clas' / else) differ only in which of
    # eval_fn's three heads is used.
    head_idx = {'sent': 0, 'clas': 1}.get(task, 2)
    w2, b2 = params['heads'][head_idx]
    w1, b1 = params['w1'], params['b1']
    D = w1.shape[1]
    C = w2.shape[1]

    # Flatten (B, S, H) -> (B*S, H): the per-(b,s) inf-norm over H and the
    # MLP trunk are row-local, so the kernel works on clean 2-D tiles.
    embed2 = embed.reshape(R, H).astype(jnp.float32)
    noise2 = noise.reshape(R, H)
    pool_t = _build_pool_t(input_mask)

    # Row tile: biggest tile that keeps double-buffered (embed, noise, pool_t)
    # comfortably inside VMEM (budgeted against v7x's smaller 64 MiB VMEM).
    tr = min(row_tile, R)
    assert R % tr == 0 and (tr % 8 == 0 or tr == R), \
        "row tile must divide B*S and satisfy the (8,128) sublane constraint"
    grid = (R // tr,)

    loss = pl.pallas_call(
        partial(_smart_fused_kernel, num_steps=num_steps),
        out_shape=jax.ShapeDtypeStruct((1, 1), jnp.float32),
        grid_spec=pltpu.PrefetchScalarGridSpec(
            num_scalar_prefetch=0,
            grid=grid,
            in_specs=[
                pl.BlockSpec((tr, H), lambda i: (i, 0)),   # embed rows
                pl.BlockSpec((tr, H), lambda i: (i, 0)),   # noise rows
                pl.BlockSpec((tr, B), lambda i: (i, 0)),   # pool_t rows
                pl.BlockSpec((H, D), lambda i: (0, 0)),    # w1
                pl.BlockSpec((1, D), lambda i: (0, 0)),    # b1
                pl.BlockSpec((D, C), lambda i: (0, 0)),    # w2 (task head)
                pl.BlockSpec((1, C), lambda i: (0, 0)),    # b2 (task head)
                pl.BlockSpec((B, C), lambda i: (0, 0)),    # clean state
            ],
            out_specs=pl.BlockSpec((1, 1), lambda i: (0, 0)),
            scratch_shapes=[pltpu.VMEM((B, D), jnp.float32)],  # pooled acc
        ),
        compiler_params=pltpu.CompilerParams(
            # The row axis carries the pooled accumulator -> reduction axis.
            dimension_semantics=("arbitrary",),
            vmem_limit_bytes=32 * 1024 * 1024,
        ),
    )(embed2, noise2, pool_t, w1, b1, w2, b2, state)
    return loss[0, 0]


@jax.jit
def clean_state(embed, input_mask, w1, b1, w2, b2):
    """state = eval_fn(embed.long(), mask)[head]  (setup path, single block)."""
    B, S, H = embed.shape
    R = B * S
    D = w1.shape[1]
    C = w2.shape[1]
    embed2 = embed.reshape(R, H).astype(jnp.float32)
    pool_t = _build_pool_t(input_mask)
    return pl.pallas_call(
        _eval_logits_kernel,
        out_shape=jax.ShapeDtypeStruct((B, C), jnp.float32),
        grid_spec=pltpu.PrefetchScalarGridSpec(
            num_scalar_prefetch=0,
            grid=(1,),
            in_specs=[
                pl.BlockSpec((R, H), lambda i: (0, 0)),
                pl.BlockSpec((R, B), lambda i: (0, 0)),
                pl.BlockSpec((H, D), lambda i: (0, 0)),
                pl.BlockSpec((1, D), lambda i: (0, 0)),
                pl.BlockSpec((D, C), lambda i: (0, 0)),
                pl.BlockSpec((1, C), lambda i: (0, 0)),
            ],
            out_specs=pl.BlockSpec((B, C), lambda i: (0, 0)),
        ),
        compiler_params=pltpu.CompilerParams(
            dimension_semantics=("arbitrary",)),
    )(embed2, pool_t, w1, b1, w2, b2)


# ------------------------------- main --------------------------------------

if __name__ == "__main__":
    B, S, H, D, C = 2, 8, 32, 64, 3   # batch, seq, hidden, mlp width, labels

    key = jax.random.PRNGKey(0)
    k_embed, k_noise, k_w1, k_heads = jax.random.split(key, 4)

    embed = jax.random.normal(k_embed, (B, S, H), jnp.float32)
    input_mask = jnp.ones((B, S), jnp.float32)

    # Deterministic synthetic eval_fn parameters (shared trunk + 3 heads).
    w1 = jax.random.normal(k_w1, (H, D), jnp.float32) * 0.1
    b1 = jnp.zeros((1, D), jnp.float32)
    head_keys = jax.random.split(k_heads, 3)
    heads = tuple(
        (jax.random.normal(hk, (D, C), jnp.float32) * 0.1,
         jnp.zeros((1, C), jnp.float32))
        for hk in head_keys
    )
    params = {'w1': w1, 'b1': b1, 'heads': heads}

    # Clean `state` = eval_fn(embed.long(), mask)[0] (task 'sent' head).
    state = clean_state(embed, input_mask, w1, b1, heads[0][0], heads[0][1])

    # row_tile=8 -> grid of 2 row tiles even at toy size, exercising the
    # pipelined accumulate / init / finalize paths.
    loss = smart_loss_3label(embed, state, input_mask, params,
                             key=k_noise, task='sent', row_tile=8)
    jax.block_until_ready(loss)
    print("KERNEL_OK")
</pallas_src>

<mosaic_0001>
module attributes {stable_mosaic.version = 11 : i64} {
  func.func @_eval_logits_kernel(%arg0: i32, %arg1: memref<16x32xf32, #tpu.memory_space<vmem>>, %arg2: memref<16x2xf32, #tpu.memory_space<vmem>>, %arg3: memref<32x64xf32, #tpu.memory_space<vmem>>, %arg4: memref<1x64xf32, #tpu.memory_space<vmem>>, %arg5: memref<64x3xf32, #tpu.memory_space<vmem>>, %arg6: memref<1x3xf32, #tpu.memory_space<vmem>>, %arg7: memref<2x3xf32, #tpu.memory_space<vmem>>) attributes {dimension_semantics = [#tpu.dimension_semantics<arbitrary>], iteration_bounds = array<i64: 1>, scalar_prefetch = 0 : i64, scratch_operands = 0 : i64, tpu.core_type = #tpu.core_type<tc>, window_params = [{pipeline_mode = #tpu.pipeline_mode<synchronous>, transform_indices = @transform_0, window_bounds = array<i64: 16, 32>}, {pipeline_mode = #tpu.pipeline_mode<synchronous>, transform_indices = @transform_1, window_bounds = array<i64: 16, 2>}, {pipeline_mode = #tpu.pipeline_mode<synchronous>, transform_indices = @transform_2, window_bounds = array<i64: 32, 64>}, {pipeline_mode = #tpu.pipeline_mode<synchronous>, transform_indices = @transform_3, window_bounds = array<i64: 1, 64>}, {pipeline_mode = #tpu.pipeline_mode<synchronous>, transform_indices = @transform_4, window_bounds = array<i64: 64, 3>}, {pipeline_mode = #tpu.pipeline_mode<synchronous>, transform_indices = @transform_5, window_bounds = array<i64: 1, 3>}, {pipeline_mode = #tpu.pipeline_mode<synchronous>, transform_indices = @transform_6, window_bounds = array<i64: 2, 3>}]} {
    %c0 = arith.constant 0 : index
    %c0_0 = arith.constant 0 : index
    %0 = vector.load %arg1[%c0, %c0_0] : memref<16x32xf32, #tpu.memory_space<vmem>>, vector<16x32xf32>
    %cst = arith.constant 0.000000e+00 : f32
    %1 = vector.broadcast %cst : f32 to vector<16x32xf32>
    %2 = arith.cmpf olt, %0, %1 : vector<16x32xf32>
    %3 = math.ceil %0 : vector<16x32xf32>
    %4 = math.floor %0 : vector<16x32xf32>
    %5 = arith.select %2, %3, %4 : vector<16x32xi1>, vector<16x32xf32>
    %6 = arith.truncf %5 : vector<16x32xf32> to vector<16x32xbf16>
    %c0_1 = arith.constant 0 : index
    %c0_2 = arith.constant 0 : index
    %7 = vector.load %arg3[%c0_1, %c0_2] : memref<32x64xf32, #tpu.memory_space<vmem>>, vector<32x64xf32>
    %8 = arith.truncf %7 : vector<32x64xf32> to vector<32x64xbf16>
    %cst_3 = arith.constant dense<0.000000e+00> : vector<16x64xf32>
    %9 = tpu.matmul %6, %8, %cst_3 {dimension_numbers = #tpu.dot_dimension_numbers<[1], [0], [0], [1], [0, 0, 1, 1], [], []>} : vector<16x32xbf16>, vector<32x64xbf16>, vector<16x64xf32> -> vector<16x64xf32>
    %c0_4 = arith.constant 0 : index
    %c0_5 = arith.constant 0 : index
    %10 = vector.load %arg4[%c0_4, %c0_5] : memref<1x64xf32, #tpu.memory_space<vmem>>, vector<1x64xf32>
    %11 = vector.broadcast %10 : vector<1x64xf32> to vector<16x64xf32>
    %12 = arith.addf %9, %11 : vector<16x64xf32>
    %cst_6 = arith.constant 0.000000e+00 : f32
    %13 = vector.broadcast %cst_6 : f32 to vector<16x64xf32>
    %14 = arith.maximumf %12, %13 : vector<16x64xf32>
    %c0_7 = arith.constant 0 : index
    %c0_8 = arith.constant 0 : index
    %15 = vector.load %arg2[%c0_7, %c0_8] : memref<16x2xf32, #tpu.memory_space<vmem>>, vector<16x2xf32>
    %16 = tpu.transpose %15, [1, 0] : vector<16x2xf32> -> vector<2x16xf32>
    %cst_9 = arith.constant dense<0.000000e+00> : vector<2x64xf32>
    %17 = tpu.matmul %16, %14, %cst_9 {dimension_numbers = #tpu.dot_dimension_numbers<[1], [0], [0], [1], [0, 0, 1, 1], [], []>} : vector<2x16xf32>, vector<16x64xf32>, vector<2x64xf32> -> vector<2x64xf32>
    %c0_10 = arith.constant 0 : index
    %c0_11 = arith.constant 0 : index
    %18 = vector.load %arg5[%c0_10, %c0_11] : memref<64x3xf32, #tpu.memory_space<vmem>>, vector<64x3xf32>
    %cst_12 = arith.constant dense<0.000000e+00> : vector<2x3xf32>
    %19 = tpu.matmul %17, %18, %cst_12 {dimension_numbers = #tpu.dot_dimension_numbers<[1], [0], [0], [1], [0, 0, 1, 1], [], []>} : vector<2x64xf32>, vector<64x3xf32>, vector<2x3xf32> -> vector<2x3xf32>
    %c0_13 = arith.constant 0 : index
    %c0_14 = arith.constant 0 : index
    %20 = vector.load %arg6[%c0_13, %c0_14] : memref<1x3xf32, #tpu.memory_space<vmem>>, vector<1x3xf32>
    %21 = vector.broadcast %20 : vector<1x3xf32> to vector<2x3xf32>
    %22 = arith.addf %19, %21 : vector<2x3xf32>
    %c0_15 = arith.constant 0 : index
    %c0_16 = arith.constant 0 : index
    %23 = vector.load %arg7[%c0_15, %c0_16] : memref<2x3xf32, #tpu.memory_space<vmem>>, vector<2x3xf32>
    tpu.vector_store %arg7[%c0_15, %c0_16], %22 {strides = array<i32>} : memref<2x3xf32, #tpu.memory_space<vmem>>, vector<2x3xf32>,
    return
  }
  func.func @transform_0(%arg0: i32) -> (i32, i32) {
    %c0_i32 = arith.constant 0 : i32
    %c0_i32_0 = arith.constant 0 : i32
    %c0_i32_1 = arith.constant 0 : i32
    return %c0_i32, %c0_i32_0 : i32, i32
  }
  func.func @transform_1(%arg0: i32) -> (i32, i32) {
    %c0_i32 = arith.constant 0 : i32
    %c0_i32_0 = arith.constant 0 : i32
    %c0_i32_1 = arith.constant 0 : i32
    return %c0_i32, %c0_i32_0 : i32, i32
  }
  func.func @transform_2(%arg0: i32) -> (i32, i32) {
    %c0_i32 = arith.constant 0 : i32
    %c0_i32_0 = arith.constant 0 : i32
    %c0_i32_1 = arith.constant 0 : i32
    return %c0_i32, %c0_i32_0 : i32, i32
  }
  func.func @transform_3(%arg0: i32) -> (i32, i32) {
    %c0_i32 = arith.constant 0 : i32
    %c0_i32_0 = arith.constant 0 : i32
    %c0_i32_1 = arith.constant 0 : i32
    return %c0_i32, %c0_i32_0 : i32, i32
  }
  func.func @transform_4(%arg0: i32) -> (i32, i32) {
    %c0_i32 = arith.constant 0 : i32
    %c0_i32_0 = arith.constant 0 : i32
    %c0_i32_1 = arith.constant 0 : i32
    return %c0_i32, %c0_i32_0 : i32, i32
  }
  func.func @transform_5(%arg0: i32) -> (i32, i32) {
    %c0_i32 = arith.constant 0 : i32
    %c0_i32_0 = arith.constant 0 : i32
    %c0_i32_1 = arith.constant 0 : i32
    return %c0_i32, %c0_i32_0 : i32, i32
  }
  func.func @transform_6(%arg0: i32) -> (i32, i32) {
    %c0_i32 = arith.constant 0 : i32
    %c0_i32_0 = arith.constant 0 : i32
    %c0_i32_1 = arith.constant 0 : i32
    return %c0_i32, %c0_i32_0 : i32, i32
  }
}

</mosaic_0001>

<bundles_post_ra>
// kernel: clean_state.1
= control target key start
LH: loop header
LB: loop body
LE: loop exit
PB: predicated region body
PF: predicated region fallthrough
CT: control target
= control target key end

     0   :  { %v406_v3 = vmov 0.0   ;;  %vm407_vm0 = vmmov 0   ;;  %s514_s0 = inlined_call_operand.vmem [shape: f32[16,32], index: 0, kind: input, shape index: {}]   ;;  %s515_s1 = inlined_call_operand.vmem [shape: f32[16,2], index: 1, kind: input, shape index: {}]   ;;  %s516_s2 = inlined_call_operand.vmem [shape: f32[32,64], index: 2, kind: input, shape index: {}]   ;;  %s517_s3 = inlined_call_operand.vmem [shape: f32[1,64], index: 3, kind: input, shape index: {}]   ;;  %s518_s4 = inlined_call_operand.vmem [shape: f32[64,3], index: 4, kind: input, shape index: {}]   ;;  %s519_s5 = inlined_call_operand.vmem [shape: f32[1,3], index: 5, kind: input, shape index: {}]   ;;  %s520_s6 = inlined_call_operand.hbm [shape: f32[2,3], index: 6, kind: output, shape index: {}]  }
   0x1   :  { %v36_v0 = vld [vmem:[%s516_s2] sm:$0xff]  ;;  %v37_v1 = vld [vmem:[%s516_s2 + $0x8] sm:$0xff]  ;;  %v38_v2 = vld [vmem:[%s516_s2 + $0x10] sm:$0xff]  ;;  %329 = vmatprep.subr.bf16.mxu0 %v406_v3  ;;  %333 = vmatprep.mubr.msk.bf16.mxu0 %vm407_vm0, %v406_v3 }
   0x2   :  { %v40_v4 = vpack.c.bf16 %v37_v1, %v36_v0  ;;  %v39_v5 = vld [vmem:[%s516_s2 + $0x18] sm:$0xff]  ;;  %v25_v6 = vld [vmem:[%s514_s0] sm:$0xff]  ;;  %v26_v7 = vld [vmem:[%s514_s0 + $0x8] sm:$0xff]  ;;  %360 = vmatprep.mubr.msk.f32.mxu1 %vm407_vm0, %v406_v3 }
   0x3   :  { %vm27_vm1 = vcmp.lt.f32.partialorder %v25_v6, 0.0  ;;  %vm28_vm2 = vcmp.lt.f32.partialorder %v26_v7, 0.0  ;;  %v29_v8 = vceil.f32 %v25_v6  ;;  %v96_v9 = vld [vmem:[%s515_s1] sm:$0xff]  ;;  %v41_v10 = vpack.c.bf16 %v39_v5, %v38_v2 }
   0x4   :  { %330 = vmatpush3.bf16.msra.mxu0 %v40_v4  ;;  %v30_v11 = vceil.f32 %v26_v7  ;;  %v31_v12 = vfloor.f32 %v25_v6  ;;  %v32_v13 = vfloor.f32 %v26_v7  ;;  %98 = vxpose.xlu0.b32.start [1/2] (short) (narrow) %v96_v9, 8 }
   0x5   :  { %11 = vsyncpa [#allocation3], 0  ;;  %331 = vmatprep.subr.bf16.mxu0 %v406_v3  ;;  %v97_v14 = vld [vmem:[%s515_s1 + $0x8] sm:$0xff]  ;;  %vm49_vm3 = vcmask 261120   ;;  %v408_v18 = vmov 0.0|0.0   ;;  %v204_v19 = vld [vmem:[%s518_s4] sm:$0xff] }
   0x6   :  { %v33_v15 = vsel %vm27_vm1, %v29_v8, %v31_v12  ;;  %v34_v16 = vsel %vm28_vm2, %v30_v11, %v32_v13  ;;  %366 = vmatprep.subr.bf16.mxu1 %v408_v18  ;;  %v205_v20 = vld [vmem:[%s518_s4 + $0x8] sm:$0xff]  ;;  %v206_v21 = vld [vmem:[%s518_s4 + $0x10] sm:$0xff]  ;;  %v207_v23 = vld [vmem:[%s518_s4 + $0x18] sm:$0xff]  ;;  %vm130_vm4 = vcmask 130048   ;;  %vm219_vm5 = vcmask 523264  }
   0x7   :  { %v35_v17 = vpack.c.bf16 %v34_v16, %v33_v15  ;;  %v367_v22 = vpack.c.bf16 %v205_v20, %v204_v19  ;;  %v370_v24 = vpack.c.bf16 %v207_v23, %v206_v21  ;;  %v208_v25 = vld [vmem:[%s518_s4 + $0x20] sm:$0xff]  ;;  %v209_v26 = vld [vmem:[%s518_s4 + $0x28] sm:$0xff]  ;;  %v210_v28 = vld [vmem:[%s518_s4 + $0x30] sm:$0xff]  ;;  %vm293_vm6 = vcmask 17408  }
   0x8   :  { %332 = vmatpush3.bf16.msra.mxu0 %v41_v10  ;;  %99 = vxpose.xlu0.b32.end [2/2] (short) (narrow) %v97_v14, 8  ;;  %v373_v27 = vpack.c.bf16 %v209_v26, %v208_v25  ;;  %v211_v29 = vld [vmem:[%s518_s4 + $0x38] sm:$0xff]  ;;  %v309_v31 = vld [vmem:[%s517_s3] ss:$0 sm:$0xff]  ;;  %s409_s3 = smov [#allocation2]  }
   0x9   :  { %363 = vmatprep.subr.bf16.mxu0 %v408_v18  ;;  %368 = vmatpush3.bf16.msra.mxu1 %v367_v22  ;;  %v376_v30 = vpack.c.bf16 %v211_v29, %v210_v28  ;;  %v312_v44 = vld [vmem:[%s519_s5] ss:$0 sm:$0xff]  ;;  %s301_s29 = sshll.u32 %s409_s3, 4  ;;  %s302_s29 = int_to_ptr.vmem [resolvable:$true] %s301_s29 }
   0xa   :  { %369 = vmatprep.subr.bf16.mxu1 %v408_v18  ;;  %s382_s30 = scalar_lea.vmem %s302_s29, 32  ;;  %p387_p1 = scmp.lt.s32.totalorder %s302_s29, %s302_s29 }
   0xb   :  { %334 = vmatmul.mubr.msk.bf16.vlgmr.msra.gmra.mrb[0].mxu0 %vm49_vm3, %v35_v17  ;;  %p383_p0 = scmp.ne.s32.totalorder %s302_s29, %s382_s30  ;;  %p388_p2 = scmp.lt.s32.totalorder %s382_s30, %s382_s30 }
   0xc   :  { %341 = vmatprep.mubr.msk.f32.mxu0 %vm407_vm0, %v406_v3 }
   0xd   :  { %371 = vmatpush3.bf16.msra.mxu1 %v370_v24  ;;  %p389_p3 = por %p388_p2, %p387_p1 }
   0xe   :  { %372 = vmatprep.subr.bf16.mxu1 %v408_v18 }
   0xf   :  { %p390_p4 = pnand %p389_p3, %p383_p0 }
  0x11   :  { %374 = vmatpush3.bf16.msra.mxu1 %v373_v27 }
  0x12   :  { %375 = vmatprep.subr.bf16.mxu1 %v408_v18 }
  0x15   :  { %377 = vmatpush3.bf16.msra.mxu1 %v376_v30 }
  0x84   :  { %v114_v41 = vpop.trf.xlu0 }
  0xde   :  { %v87_v32 = vpop.f32.mrb[0].mxu0 }
  0xdf   :  { %v88_v33 = vadd.f32 %v309_v31, %v87_v32  ;;  %v335_v34 = vpop.f32.mrb[1].mxu0 }
  0xe0   :  { %v90_v35 = vpop.f32.mrb[2].mxu0 }
  0xe1   :  { %v91_v36 = vadd.f32 %v309_v31, %v90_v35  ;;  %v336_v37 = vpop.f32.mrb[3].mxu0  ;;  %v94_v38 = vmax.f32 %v88_v33, 0.0 }
  0xe3   :  { %v95_v39 = vmax.f32 %v91_v36, 0.0 }
  0xe5   :  { %v364_v40 = vpack.c.bf16 %v95_v39, %v94_v38 }
  0xe7   :  { %365 = vmatpush3.bf16.msra.mxu0 %v364_v40 }
  0xea   :  { %342 = vmatmul.mubr.msk.f32.vlgmr.msra.gmra.mrb[4].mxu0 %vm130_vm4, %v114_v41 }
 0x1bd   :  { %v200_v42 = vpop.f32.mrb[4].mxu0 }
 0x1be   :  { %v343_v43 = vpop.f32.mrb[5].mxu0  ;;  %361 = vmatmul.mubr.msk.f32.vlgmr.msra.gmra.mrb[0].mxu1 %vm219_vm5, %v200_v42 }
 0x291   :  { %v289_v45 = vpop.f32.mrb[0].mxu1 }
 0x292   :  { %v290_v46 = vadd.f32 %v312_v44, %v289_v45  ;;  %v362_v47 = vpop.f32.mrb[1].mxu1 }
 0x294   :  { %294 = vst.msk [vmem:[#allocation2] sm:$0x3] %vm293_vm6, %v290_v46 }
 0x295   :  { %393 = shalt.err (!%p390_p4)
}
 0x296   :  { %s394_s9 = scalar_lea.hbm %s520_s6, 32 }
 0x297   :  { %p395_p5 = scmp.ne.s32.totalorder %s520_s6, %s394_s9  ;;  %p398_p6 = scmp.lt.u32.totalorder %s394_s9, %s520_s6 }
 0x299   :  { %p400_p7 = pnand %p398_p6, %p395_p5 }
 0x29b   :  { %403 = shalt.err (!%p400_p7)
}
 0x29c   :  { %304 = dma.vmem_to_hbm [thread:$0]  %s302_s29, 32, %s520_s6, [#allocation3]  }
 0x29d   :  { %404 = dma.done.wait [#allocation3], 32  }
 0x29e   :  { %405 = vsyncadd [#allocation3], 4294967264 }
 0x29f   :  { %308 = vsyncpa [#allocation3], 1 }

</bundles_post_ra>
